<compile_context>
chip_gen: v7x
topology: tpu7x:2x2x1
jax: 0.10.0
libtpu: 0.0.40
codegen_flags: <defaults>
</compile_context>

<pallas_src>
import functools

import jax
import jax.numpy as jnp
from jax.experimental import pallas as pl
from jax.experimental.pallas import tpu as pltpu


def _round_up(x, m):
    return ((x + m - 1) // m) * m


def _cdiv(a, b):
    return (a + b - 1) // b


def _pick_tile(B, tb):
    """Batch tile: multiple of 8; >=2 grid steps once the batch is big enough
    (v7x megacore); single step for small batches (v5e/v6e overhead)."""
    tb = _round_up(max(int(tb), 8), 8)
    if B <= 256:
        return min(tb, _round_up(B, 8))
    return min(tb, _round_up(_cdiv(B, 2), 256))


def _fused_kernel(x_ref, wf_ref, w2_ref, b2_ref, o_ref, *,
                  n_cat, n_cont, v_total, offsets):
    """x_ref:(TB, n_cat+n_cont) f32 raw input; wf_ref:(Kp,128) fused weights
    (stacked emb@W1 | W1_cont | BN-bias row, BN scale folded in);
    w2_ref:(1,128); b2_ref:(1,1) SMEM; o_ref:(1,1,TB)."""
    TB = x_ref.shape[0]
    Kp = wf_ref.shape[0]

    x = x_ref[...]                                             # (TB, n_cat+n_cont)
    lane = jax.lax.broadcasted_iota(jnp.int32, (TB, Kp), 1)

    # --- build the fused (TB, Kp) activation in VMEM -------------------------
    # Multi-hot over the stacked embedding vocabulary (== PyTorch x[:, e].long()
    # indexing nn.Embedding e).  Offsets are static Python ints.
    # NOTE: out-of-range ids silently contribute zero (PyTorch would raise).
    cat = x[:, :n_cat].astype(jnp.int32)                       # (TB, n_cat)
    act = ((cat[:, 0:1] + offsets[0]) == lane).astype(jnp.float32)
    for e in range(1, n_cat):
        act = act + ((cat[:, e:e + 1] + offsets[e]) == lane).astype(jnp.float32)
    # Continuous columns -> lanes [V, V+n_cont).
    for c in range(n_cont):
        act = act + jnp.where(lane == v_total + c,
                              x[:, n_cat + c:n_cat + c + 1], 0.0)
    # Constant-1 lane activates the folded BatchNorm bias row.
    act = act + (lane == v_total + n_cont).astype(jnp.float32)

    # --- layer 1 (+BN) as ONE MXU pass, then ReLU ----------------------------
    h = jnp.dot(act, wf_ref[...], preferred_element_type=jnp.float32)  # (TB,128)
    h = jnp.maximum(h, 0.0)
    # TODO(synk): training-mode Dropout(0.2) omitted; inference = identity.

    # --- layer 2 on the MXU, produced lane-dense: (1,128)@(128,TB) -> (1,TB) --
    z = jnp.dot(w2_ref[...], h.T, preferred_element_type=jnp.float32)
    z = z + b2_ref[0, 0]
    o_ref[...] = jax.nn.sigmoid(z).reshape(o_ref.shape)


@functools.partial(jax.jit,
                   static_argnames=("n_cat", "n_cont", "v_total", "offsets", "tb"))
def structured_forward(x, wf, w2_row, b2, *, n_cat, n_cont, v_total, offsets,
                       tb=1024):
    """x: (B, n_cat + n_cont) float32.  First n_cat columns are categorical
    indices stored as floats (like PyTorch's x[:, e].long()); rest continuous."""
    B, in_w = x.shape
    Kp, H = wf.shape
    TB = _pick_tile(B, tb)
    nt = _cdiv(B, TB)

    kernel = functools.partial(_fused_kernel, n_cat=n_cat, n_cont=n_cont,
                               v_total=v_total, offsets=offsets)

    out = pl.pallas_call(
        kernel,
        out_shape=jax.ShapeDtypeStruct((nt, 1, TB), jnp.float32),
        grid=(nt,),
        in_specs=[
            pl.BlockSpec((TB, in_w), lambda i: (i, 0)),          # raw x tile
            pl.BlockSpec((Kp, H), lambda i: (0, 0)),             # fused weights
            pl.BlockSpec((1, H), lambda i: (0, 0)),              # W2 as a row
            pl.BlockSpec(memory_space=pltpu.MemorySpace.SMEM),   # b2 scalar
        ],
        out_specs=pl.BlockSpec((1, 1, TB), lambda i: (i, 0, 0)),  # lane-dense row
        compiler_params=pltpu.CompilerParams(
            dimension_semantics=("parallel",)),
    )(x, wf, w2_row, b2)

    # (nt,1,TB) -> (nt*TB,1); drop the ragged-tile garbage rows.
    return out.reshape(nt * TB, 1)[:B]


def prepare_params(emb_tables, hs, w1, gamma, beta, running_mean, running_var,
                   eps, w2, b2):
    """One-time (weight-load) constant folding.  Returns (arrays, static_meta)."""
    n_cat = len(emb_tables)
    H = w1.shape[1]
    bn_scale = gamma / jnp.sqrt(running_var + eps)               # (H,)
    bn_bias = (beta - running_mean * bn_scale).reshape(1, H)
    w1f = w1 * bn_scale[None, :]                                 # fold BN scale

    # Pre-multiply each embedding table into its W1 slice -> (vocab_e, H).
    t_parts = [emb_tables[e] @ w1f[e * hs:(e + 1) * hs, :] for e in range(n_cat)]
    t_all = jnp.concatenate(t_parts, axis=0)                     # (V, H)
    w_cont = w1f[n_cat * hs:, :]                                 # (n_cont, H)
    V = int(t_all.shape[0])
    n_cont = int(w_cont.shape[0])

    # Fused weight matrix: [emb@W1 ; W1_cont ; BN bias row], rows padded to 128.
    K = V + n_cont + 1
    Kp = max(128, _round_up(K, 128))
    wf = jnp.concatenate([t_all, w_cont, bn_bias], axis=0)       # (K, H)
    wf = jnp.pad(wf, ((0, Kp - K), (0, 0)))                      # (Kp, H)

    offs, acc = [], 0
    for tbl in emb_tables:
        offs.append(acc)
        acc += int(tbl.shape[0])
    offsets = tuple(offs)                                        # static ints

    w2_row = w2.reshape(1, H)
    b2_s = jnp.asarray(b2, jnp.float32).reshape(1, 1)
    arrays = (wf, w2_row, b2_s)
    meta = dict(n_cat=n_cat, n_cont=n_cont, v_total=V, offsets=offsets)
    return arrays, meta


if __name__ == "__main__":
    key = jax.random.PRNGKey(0)

    # Module config (small, consistent with the module's __init__):
    vocab_sizes = [5, 7, 4]          # emb_len values for 3 categorical columns
    hs = 8                           # embedding dim
    n_cat = len(vocab_sizes)
    n_cont = 5
    input_width = n_cat + n_cont     # raw input columns = 8
    width = n_cat * hs + n_cont      # DNN input width = 3*8 + 5 = 29
    hidden = 128
    B = 8

    ks = jax.random.split(key, 20)

    emb_tables = [
        jax.random.normal(ks[i], (vocab_sizes[i], hs), jnp.float32) * 0.1
        for i in range(n_cat)
    ]
    w1 = jax.random.normal(ks[4], (width, hidden), jnp.float32) * 0.05
    gamma = 1.0 + 0.1 * jax.random.normal(ks[5], (hidden,), jnp.float32)
    beta = 0.1 * jax.random.normal(ks[6], (hidden,), jnp.float32)
    running_mean = 0.1 * jax.random.normal(ks[7], (hidden,), jnp.float32)
    running_var = jnp.abs(jax.random.normal(ks[8], (hidden,), jnp.float32)) + 0.5
    eps = 1e-5
    w2 = jax.random.normal(ks[9], (hidden, 1), jnp.float32) * 0.05
    b2 = jax.random.normal(ks[10], (1, 1), jnp.float32) * 0.05

    (wf, w2_row, b2_s), meta = prepare_params(
        emb_tables, hs, w1, gamma, beta, running_mean, running_var, eps, w2, b2)

    def make_x(k_cat, k_cont, batch):
        kk = jax.random.split(k_cat, n_cat)
        cat_cols = jnp.stack(
            [jax.random.randint(kk[i], (batch,), 0, vocab_sizes[i]).astype(jnp.float32)
             for i in range(n_cat)], axis=1)
        cont_cols = jax.random.normal(k_cont, (batch, n_cont), jnp.float32)
        return jnp.concatenate([cat_cols, cont_cols], axis=1)   # (batch, 8)

    def reference(x):
        bn_scale = gamma / jnp.sqrt(running_var + eps)
        bn_bias_r = beta - running_mean * bn_scale
        embx = jnp.concatenate(
            [jnp.take(emb_tables[e], x[:, e].astype(jnp.int32), axis=0)
             for e in range(n_cat)], axis=1)
        feats = jnp.concatenate([embx, x[:, n_cat:]], axis=1)
        h = jnp.dot(feats, w1, precision=jax.lax.Precision.HIGHEST)
        h = jnp.maximum(h * bn_scale[None, :] + bn_bias_r[None, :], 0.0)
        return jax.nn.sigmoid(jnp.dot(h, w2, precision=jax.lax.Precision.HIGHEST) + b2)

    # Small-batch check (single tile).
    x = make_x(ks[11], ks[12], B)
    out = jax.block_until_ready(structured_forward(x, wf, w2_row, b2_s, **meta))
    ref = reference(x)
    assert out.shape == (B, 1)
    assert jnp.allclose(out, ref, atol=2e-5, rtol=1e-5)

    # Multi-tile + ragged-batch path check (grid > 1, last tile partially OOB).
    B2 = 300
    x2 = make_x(ks[13], ks[14], B2)
    out2 = jax.block_until_ready(
        structured_forward(x2, wf, w2_row, b2_s, tb=128, **meta))
    ref2 = reference(x2)
    assert out2.shape == (B2, 1)
    assert jnp.allclose(out2, ref2, atol=2e-5, rtol=1e-5)

    print("KERNEL_OK")
</pallas_src>

<mosaic_0001>
module attributes {stable_mosaic.version = 11 : i64} {
  func.func @_fused_kernel(%arg0: i32, %arg1: memref<8x8xf32, #tpu.memory_space<vmem>>, %arg2: memref<128x128xf32, #tpu.memory_space<vmem>>, %arg3: memref<1x128xf32, #tpu.memory_space<vmem>>, %arg4: memref<1x1xf32, #tpu.memory_space<smem>>, %arg5: memref<1x1x8xf32, #tpu.memory_space<vmem>>) attributes {dimension_semantics = [#tpu.dimension_semantics<parallel>], iteration_bounds = array<i64: 1>, scalar_prefetch = 0 : i64, scratch_operands = 0 : i64, tpu.core_type = #tpu.core_type<tc>, window_params = [{transform_indices = @transform_0, window_bounds = array<i64: 8, 8>}, {pipeline_mode = #tpu.pipeline_mode<synchronous>, transform_indices = @transform_1, window_bounds = array<i64: 128, 128>}, {pipeline_mode = #tpu.pipeline_mode<synchronous>, transform_indices = @transform_2, window_bounds = array<i64: 1, 128>}, {transform_indices = @transform_3, window_bounds = array<i64: 1, 1>}, {transform_indices = @transform_4, window_bounds = array<i64: 1, 1, 8>}]} {
    %c0 = arith.constant 0 : index
    %c0_0 = arith.constant 0 : index
    %0 = vector.load %arg1[%c0, %c0_0] : memref<8x8xf32, #tpu.memory_space<vmem>>, vector<8x8xf32>
    %1 = tpu.iota {dimensions = array<i32: 1>} : vector<8x128xi32>
    %2 = vector.extract_strided_slice %0 {offsets = [0, 0], sizes = [8, 3], strides = [1, 1]} : vector<8x8xf32> to vector<8x3xf32>
    %3 = arith.fptosi %2 : vector<8x3xf32> to vector<8x3xi32>
    %4 = vector.extract_strided_slice %3 {offsets = [0, 0], sizes = [8, 1], strides = [1, 1]} : vector<8x3xi32> to vector<8x1xi32>
    %c0_i32 = arith.constant 0 : i32
    %5 = vector.broadcast %c0_i32 : i32 to vector<8x1xi32>
    %6 = arith.addi %4, %5 : vector<8x1xi32>
    %7 = vector.broadcast %6 : vector<8x1xi32> to vector<8x128xi32>
    %8 = arith.cmpi eq, %7, %1 : vector<8x128xi32>
    %9 = arith.extui %8 : vector<8x128xi1> to vector<8x128xi32>
    %10 = arith.sitofp %9 : vector<8x128xi32> to vector<8x128xf32>
    %11 = vector.extract_strided_slice %3 {offsets = [0, 1], sizes = [8, 1], strides = [1, 1]} : vector<8x3xi32> to vector<8x1xi32>
    %c5_i32 = arith.constant 5 : i32
    %12 = vector.broadcast %c5_i32 : i32 to vector<8x1xi32>
    %13 = arith.addi %11, %12 : vector<8x1xi32>
    %14 = vector.broadcast %13 : vector<8x1xi32> to vector<8x128xi32>
    %15 = arith.cmpi eq, %14, %1 : vector<8x128xi32>
    %16 = arith.extui %15 : vector<8x128xi1> to vector<8x128xi32>
    %17 = arith.sitofp %16 : vector<8x128xi32> to vector<8x128xf32>
    %18 = arith.addf %10, %17 : vector<8x128xf32>
    %19 = vector.extract_strided_slice %3 {offsets = [0, 2], sizes = [8, 1], strides = [1, 1]} : vector<8x3xi32> to vector<8x1xi32>
    %c12_i32 = arith.constant 12 : i32
    %20 = vector.broadcast %c12_i32 : i32 to vector<8x1xi32>
    %21 = arith.addi %19, %20 : vector<8x1xi32>
    %22 = vector.broadcast %21 : vector<8x1xi32> to vector<8x128xi32>
    %23 = arith.cmpi eq, %22, %1 : vector<8x128xi32>
    %24 = arith.extui %23 : vector<8x128xi1> to vector<8x128xi32>
    %25 = arith.sitofp %24 : vector<8x128xi32> to vector<8x128xf32>
    %26 = arith.addf %18, %25 : vector<8x128xf32>
    %c16_i32 = arith.constant 16 : i32
    %27 = vector.broadcast %c16_i32 : i32 to vector<8x128xi32>
    %28 = arith.cmpi eq, %1, %27 : vector<8x128xi32>
    %29 = vector.extract_strided_slice %0 {offsets = [0, 3], sizes = [8, 1], strides = [1, 1]} : vector<8x8xf32> to vector<8x1xf32>
    %cst = arith.constant 0.000000e+00 : f32
    %30 = vector.shape_cast %29 : vector<8x1xf32> to vector<8x1xf32>
    %31 = vector.broadcast %30 : vector<8x1xf32> to vector<8x128xf32>
    %32 = vector.broadcast %cst : f32 to vector<8x128xf32>
    %33 = arith.select %28, %31, %32 : vector<8x128xi1>, vector<8x128xf32>
    %34 = arith.addf %26, %33 : vector<8x128xf32>
    %c17_i32 = arith.constant 17 : i32
    %35 = vector.broadcast %c17_i32 : i32 to vector<8x128xi32>
    %36 = arith.cmpi eq, %1, %35 : vector<8x128xi32>
    %37 = vector.extract_strided_slice %0 {offsets = [0, 4], sizes = [8, 1], strides = [1, 1]} : vector<8x8xf32> to vector<8x1xf32>
    %cst_1 = arith.constant 0.000000e+00 : f32
    %38 = vector.shape_cast %37 : vector<8x1xf32> to vector<8x1xf32>
    %39 = vector.broadcast %38 : vector<8x1xf32> to vector<8x128xf32>
    %40 = vector.broadcast %cst_1 : f32 to vector<8x128xf32>
    %41 = arith.select %36, %39, %40 : vector<8x128xi1>, vector<8x128xf32>
    %42 = arith.addf %34, %41 : vector<8x128xf32>
    %c18_i32 = arith.constant 18 : i32
    %43 = vector.broadcast %c18_i32 : i32 to vector<8x128xi32>
    %44 = arith.cmpi eq, %1, %43 : vector<8x128xi32>
    %45 = vector.extract_strided_slice %0 {offsets = [0, 5], sizes = [8, 1], strides = [1, 1]} : vector<8x8xf32> to vector<8x1xf32>
    %cst_2 = arith.constant 0.000000e+00 : f32
    %46 = vector.shape_cast %45 : vector<8x1xf32> to vector<8x1xf32>
    %47 = vector.broadcast %46 : vector<8x1xf32> to vector<8x128xf32>
    %48 = vector.broadcast %cst_2 : f32 to vector<8x128xf32>
    %49 = arith.select %44, %47, %48 : vector<8x128xi1>, vector<8x128xf32>
    %50 = arith.addf %42, %49 : vector<8x128xf32>
    %c19_i32 = arith.constant 19 : i32
    %51 = vector.broadcast %c19_i32 : i32 to vector<8x128xi32>
    %52 = arith.cmpi eq, %1, %51 : vector<8x128xi32>
    %53 = vector.extract_strided_slice %0 {offsets = [0, 6], sizes = [8, 1], strides = [1, 1]} : vector<8x8xf32> to vector<8x1xf32>
    %cst_3 = arith.constant 0.000000e+00 : f32
    %54 = vector.shape_cast %53 : vector<8x1xf32> to vector<8x1xf32>
    %55 = vector.broadcast %54 : vector<8x1xf32> to vector<8x128xf32>
    %56 = vector.broadcast %cst_3 : f32 to vector<8x128xf32>
    %57 = arith.select %52, %55, %56 : vector<8x128xi1>, vector<8x128xf32>
    %58 = arith.addf %50, %57 : vector<8x128xf32>
    %c20_i32 = arith.constant 20 : i32
    %59 = vector.broadcast %c20_i32 : i32 to vector<8x128xi32>
    %60 = arith.cmpi eq, %1, %59 : vector<8x128xi32>
    %61 = vector.extract_strided_slice %0 {offsets = [0, 7], sizes = [8, 1], strides = [1, 1]} : vector<8x8xf32> to vector<8x1xf32>
    %cst_4 = arith.constant 0.000000e+00 : f32
    %62 = vector.shape_cast %61 : vector<8x1xf32> to vector<8x1xf32>
    %63 = vector.broadcast %62 : vector<8x1xf32> to vector<8x128xf32>
    %64 = vector.broadcast %cst_4 : f32 to vector<8x128xf32>
    %65 = arith.select %60, %63, %64 : vector<8x128xi1>, vector<8x128xf32>
    %66 = arith.addf %58, %65 : vector<8x128xf32>
    %c21_i32 = arith.constant 21 : i32
    %67 = vector.broadcast %c21_i32 : i32 to vector<8x128xi32>
    %68 = arith.cmpi eq, %1, %67 : vector<8x128xi32>
    %69 = arith.extui %68 : vector<8x128xi1> to vector<8x128xi32>
    %70 = arith.sitofp %69 : vector<8x128xi32> to vector<8x128xf32>
    %71 = arith.addf %66, %70 : vector<8x128xf32>
    %c0_5 = arith.constant 0 : index
    %c0_6 = arith.constant 0 : index
    %72 = vector.load %arg2[%c0_5, %c0_6] : memref<128x128xf32, #tpu.memory_space<vmem>>, vector<128x128xf32>
    %cst_7 = arith.constant dense<0.000000e+00> : vector<8x128xf32>
    %73 = tpu.matmul %71, %72, %cst_7 {dimension_numbers = #tpu.dot_dimension_numbers<[1], [0], [0], [1], [0, 0, 1, 1], [], []>} : vector<8x128xf32>, vector<128x128xf32>, vector<8x128xf32> -> vector<8x128xf32>
    %cst_8 = arith.constant 0.000000e+00 : f32
    %74 = vector.broadcast %cst_8 : f32 to vector<8x128xf32>
    %75 = arith.maximumf %73, %74 : vector<8x128xf32>
    %c0_9 = arith.constant 0 : index
    %c0_10 = arith.constant 0 : index
    %76 = vector.load %arg3[%c0_9, %c0_10] : memref<1x128xf32, #tpu.memory_space<vmem>>, vector<1x128xf32>
    %77 = tpu.transpose %75, [1, 0] : vector<8x128xf32> -> vector<128x8xf32>
    %cst_11 = arith.constant dense<0.000000e+00> : vector<1x8xf32>
    %78 = tpu.matmul %76, %77, %cst_11 {dimension_numbers = #tpu.dot_dimension_numbers<[1], [0], [0], [1], [0, 0, 1, 1], [], []>} : vector<1x128xf32>, vector<128x8xf32>, vector<1x8xf32> -> vector<1x8xf32>
    %c0_12 = arith.constant 0 : index
    %c0_13 = arith.constant 0 : index
    %79 = memref.load %arg4[%c0_12, %c0_13] : memref<1x1xf32, #tpu.memory_space<smem>>
    %80 = vector.broadcast %79 : f32 to vector<1x8xf32>
    %81 = arith.addf %78, %80 : vector<1x8xf32>
    %82 = arith.negf %81 : vector<1x8xf32>
    %83 = math.exp %82 : vector<1x8xf32>
    %cst_14 = arith.constant 1.000000e+00 : f32
    %84 = vector.broadcast %cst_14 : f32 to vector<1x8xf32>
    %85 = arith.addf %84, %83 : vector<1x8xf32>
    %86 = arith.divf %84, %85 : vector<1x8xf32>
    %87 = vector.shape_cast %86 : vector<1x8xf32> to vector<1x1x8xf32>
    %c0_15 = arith.constant 0 : index
    %c0_16 = arith.constant 0 : index
    %c0_17 = arith.constant 0 : index
    %88 = vector.load %arg5[%c0_15, %c0_16, %c0_17] : memref<1x1x8xf32, #tpu.memory_space<vmem>>, vector<1x1x8xf32>
    tpu.vector_store %arg5[%c0_15, %c0_16, %c0_17], %87 {strides = array<i32>} : memref<1x1x8xf32, #tpu.memory_space<vmem>>, vector<1x1x8xf32>,
    return
  }
  func.func @transform_0(%arg0: i32) -> (i32, i32) {
    %c0_i32 = arith.constant 0 : i32
    %c0_i32_0 = arith.constant 0 : i32
    return %arg0, %c0_i32 : i32, i32
  }
  func.func @transform_1(%arg0: i32) -> (i32, i32) {
    %c0_i32 = arith.constant 0 : i32
    %c0_i32_0 = arith.constant 0 : i32
    %c0_i32_1 = arith.constant 0 : i32
    return %c0_i32, %c0_i32_0 : i32, i32
  }
  func.func @transform_2(%arg0: i32) -> (i32, i32) {
    %c0_i32 = arith.constant 0 : i32
    %c0_i32_0 = arith.constant 0 : i32
    %c0_i32_1 = arith.constant 0 : i32
    return %c0_i32, %c0_i32_0 : i32, i32
  }
  func.func @transform_3(%arg0: i32) -> (i32, i32) {
    %c0_i32 = arith.constant 0 : i32
    %c0_i32_0 = arith.constant 0 : i32
    %c0_i32_1 = arith.constant 0 : i32
    return %c0_i32, %c0_i32_0 : i32, i32
  }
  func.func @transform_4(%arg0: i32) -> (i32, i32, i32) {
    %c0_i32 = arith.constant 0 : i32
    %c0_i32_0 = arith.constant 0 : i32
    %c0_i32_1 = arith.constant 0 : i32
    return %arg0, %c0_i32, %c0_i32_0 : i32, i32, i32
  }
}

</mosaic_0001>

<bundles_post_ra>
// kernel: structured_forward.1
= control target key start
LH: loop header
LB: loop body
LE: loop exit
PB: predicated region body
PF: predicated region fallthrough
CT: control target
= control target key end

     0   :  { %10 = vsyncpa [#allocation4], 0  ;;  %s591_s0 = inlined_call_operand.hbm [shape: f32[8,8], index: 0, kind: input, shape index: {}]   ;;  %s592_s1 = inlined_call_operand.hbm [shape: f32[128,128], index: 1, kind: input, shape index: {}]   ;;  %s593_s2 = inlined_call_operand.vmem [shape: f32[1,128], index: 2, kind: input, shape index: {}]   ;;  %s594_s3 = inlined_call_operand.<no memory space> [shape: f32[1,1], index: 3, kind: input, shape index: {}]   ;;  %s595_s4 = inlined_call_operand.hbm [shape: f32[1,1,8], index: 4, kind: output, shape index: {}]  }
   0x1   :  { %11 = vsyncpa [#allocation7], 0 }
   0x2   :  { %12 = vsyncpa [#allocation5], 0  ;;  %s486_s15 = smov [#allocation3]   ;;  %s487_s17 = smov [#allocation6]  }
   0x3   :  { %s19_s16 = sshll.u32 %s486_s15, 4  ;;  %s28_s18 = sshll.u32 %s487_s17, 4  ;;  %s20_s16 = int_to_ptr.vmem [resolvable:$true] %s19_s16  ;;  %s527_s18 = int_to_ptr.vmem [resolvable:$true] %s28_s18 }
   0x4   :  { %s414_s21 = scalar_lea.hbm %s591_s0, 128 }
   0x5   :  { %p415_p0 = scmp.ne.s32.totalorder %s591_s0, %s414_s21  ;;  %p418_p1 = scmp.lt.u32.totalorder %s414_s21, %s591_s0 }
   0x7   :  { %p420_p2 = pnand %p418_p1, %p415_p0 }
   0x9   :  { %423 = shalt.err (!%p420_p2)
}
   0xa   :  { %s424_s26 = scalar_lea.vmem %s20_s16, 128  ;;  %p429_p4 = scmp.lt.s32.totalorder %s20_s16, %s20_s16 }
   0xb   :  { %p425_p3 = scmp.ne.s32.totalorder %s20_s16, %s424_s26  ;;  %p430_p5 = scmp.lt.s32.totalorder %s424_s26, %s424_s26 }
   0xd   :  { %p431_p6 = por %p430_p5, %p429_p4 }
   0xf   :  { %p432_p7 = pnand %p431_p6, %p425_p3 }
  0x11   :  { %435 = shalt.err (!%p432_p7)
}
  0x12   :  { %22 = dma.hbm_to_vmem [thread:$0]  %s591_s0, 128, %s20_s16, [#allocation4]  }
  0x13   :  { %s436_s5 = scalar_lea.hbm %s592_s1, 2048 }
  0x14   :  { %p437_p8 = scmp.ne.s32.totalorder %s592_s1, %s436_s5  ;;  %p440_p9 = scmp.lt.u32.totalorder %s436_s5, %s592_s1 }
  0x16   :  { %p442_p10 = pnand %p440_p9, %p437_p8 }
  0x18   :  { %445 = shalt.err (!%p442_p10)
}
  0x19   :  { %s446_s10 = scalar_lea.vmem %s527_s18, 2048  ;;  %p451_p12 = scmp.lt.s32.totalorder %s527_s18, %s527_s18 }
  0x1a   :  { %p447_p11 = scmp.ne.s32.totalorder %s527_s18, %s446_s10  ;;  %p452_p13 = scmp.lt.s32.totalorder %s446_s10, %s446_s10 }
  0x1c   :  { %p453_p0 = por %p452_p13, %p451_p12 }
  0x1e   :  { %p454_p1 = pnand %p453_p0, %p447_p11 }
  0x20   :  { %457 = shalt.err (!%p454_p1)
}
  0x21   :  { %s488_s0 = smov 128   ;;  %s489_s11 = smov 8  }
  0x22   :  { %34 = dma.hbm_to_vmem [thread:$0]  %s592_s1, 2048, %s527_s18, [#allocation7], %s488_s0, %s488_s0, %s489_s11  }
  0x23   :  { %480 = dma.done.wait [#allocation4], 128  }
  0x24   :  { %481 = vsyncadd [#allocation4], 4294967168 }
  0x25   :  { %482 = dma.done.wait [#allocation7], 2048  }
  0x26   :  { %483 = vsyncadd [#allocation7], 4294965248  ;;  %v490_v0 = vmov 3   ;;  %v491_v1 = vmov 0   ;;  %v492_v2 = vmov 0.0|0.0   ;;  %v45_v3 = vld [vmem:[#allocation3] sm:$0xff]  ;;  %v46_v40 = vlaneseq }
  0x27   :  { %403 = vset.pattern.permute.xlu1 %v490_v0  ;;  %401 = vset.pattern.permute.xlu0 %v491_v1  ;;  %v111_v4 = vld [vmem:[#allocation6] sm:$0xff]  ;;  %v112_v5 = vld [vmem:[#allocation6 + $0x8] sm:$0xff]  ;;  %v383_v6 = vtrunc.f32 %v45_v3  ;;  %v113_v8 = vld [vmem:[#allocation6 + $0x10] sm:$0xff]  ;;  %v493_v10 = vmov 0.0   ;;  %v494_v15 = vmov 2   ;;  %v495_v21 = vmov 1  }
  0x28   :  { %359 = vmatprep.subr.bf16.mxu0 %v492_v2  ;;  %74 = vperm.xlu1 %403, %v45_v3   ;;  %v360_v7 = vpack.c.bf16 %v112_v5, %v111_v4  ;;  %v114_v9 = vld [vmem:[#allocation6 + $0x18] sm:$0xff]  ;;  %v115_v13 = vld [vmem:[#allocation6 + $0x20] sm:$0xff]  ;;  %v116_v14 = vld [vmem:[#allocation6 + $0x28] sm:$0xff]  ;;  %v496_v22 = vmov 4   ;;  %v497_v26 = vmov 5   ;;  %v498_v28 = vmov 6  }
  0x29   :  { %354 = vmatprep.subr.mxu1 %v493_v10  ;;  %v384_v11 = vcvt.f32.s32 %v383_v6  ;;  %v363_v12 = vpack.c.bf16 %v114_v9, %v113_v8  ;;  %v366_v18 = vpack.c.bf16 %v116_v14, %v115_v13  ;;  %v117_v19 = vld [vmem:[#allocation6 + $0x30] sm:$0xff]  ;;  %v118_v20 = vld [vmem:[#allocation6 + $0x38] sm:$0xff]  ;;  %v119_v24 = vld [vmem:[#allocation6 + $0x40] sm:$0xff]  ;;  %v499_v32 = vmov 7   ;;  %s501_s17 = smov [#allocation8]  }
  0x2a   :  { %361 = vmatpush3.bf16.msra.mxu0 %v360_v7  ;;  %v369_v23 = vpack.c.bf16 %v118_v20, %v117_v19  ;;  %v120_v25 = vld [vmem:[#allocation6 + $0x48] sm:$0xff]  ;;  %v121_v29 = vld [vmem:[#allocation6 + $0x50] sm:$0xff]  ;;  %v122_v30 = vld [vmem:[#allocation6 + $0x58] sm:$0xff]  ;;  %vm500_vm0 = vmmov 0   ;;  %v47_v42 = vand.u32 127, %v46_v40  ;;  %v200_v6 = vstv %s594_s3  ;;  %s285_s18 = sshll.u32 %s501_s17, 4  ;;  %s286_s18 = int_to_ptr.vmem [resolvable:$true] %s285_s18 }
  0x2b   :  { %362 = vmatprep.subr.bf16.mxu0 %v492_v2  ;;  %50 = vperm.xlu0 %401, %v384_v11   ;;  %v63_v16 = vadd.s32 12, %v384_v11  ;;  %v55_v17 = vadd.s32 5, %v384_v11  ;;  %v372_v27 = vpack.c.bf16 %v120_v25, %v119_v24  ;;  %v375_v31 = vpack.c.bf16 %v122_v30, %v121_v29  ;;  %v123_v33 = vld [vmem:[#allocation6 + $0x60] sm:$0xff]  ;;  %v124_v34 = vld [vmem:[#allocation6 + $0x68] sm:$0xff]  ;;  %v125_v36 = vld [vmem:[#allocation6 + $0x70] sm:$0xff]  ;;  %s462_s19 = scalar_lea.vmem %s286_s18, 32  ;;  %p463_p3 = scmp.lt.s32.totalorder %s286_s18, %s286_s18 }
  0x2c   :  { %404 = vset.pattern.permute.xlu1 %v494_v15  ;;  %v378_v35 = vpack.c.bf16 %v124_v34, %v123_v33  ;;  %v126_v37 = vld [vmem:[#allocation6 + $0x78] sm:$0xff]  ;;  %351 = vmatprep.mubr.msk.f32.mxu0 %vm500_vm0, %v493_v10  ;;  %vm71_vm4 = vcmp.eq.s32.totalorder %v47_v42, 16  ;;  %vm79_vm5 = vcmp.eq.s32.totalorder %v47_v42, 17  ;;  %vm86_vm6 = vcmp.eq.s32.totalorder %v47_v42, 18 }
  0x2d   :  { %65 = vperm.xlu1 %404, %v63_v16   ;;  %v381_v38 = vpack.c.bf16 %v126_v37, %v125_v36  ;;  %356 = vmatprep.mubr.msk.f32.mxu1 %vm500_vm0, %v493_v10  ;;  %vm93_vm7 = vcmp.eq.s32.totalorder %v47_v42, 19  ;;  %vm100_vm8 = vcmp.eq.s32.totalorder %v47_v42, 20  ;;  %vm107_vm9 = vcmp.eq.s32.totalorder %v47_v42, 21  ;;  %v198_v5 = vld [vmem:[%s593_s2] sm:$0x1]  ;;  %s458_s2 = scalar_lea.vmem %s286_s18, 16 }
  0x2e   :  { %364 = vmatpush3.bf16.msra.mxu0 %v363_v12  ;;  %v298_v63 = vsel %vm107_vm9, 1.0, %v493_v10  ;;  %vm277_vm10 = vcmask 57344   ;;  %p459_p2 = scmp.ne.s32.totalorder %s286_s18, %s458_s2  ;;  %p464_p4 = scmp.lt.s32.totalorder %s462_s19, %s458_s2 }
  0x2f   :  { %365 = vmatprep.subr.bf16.mxu0 %v492_v2  ;;  %402 = vset.pattern.permute.xlu0 %v495_v21 }
  0x30   :  { %57 = vperm.xlu0 %402, %v55_v17   ;;  %p465_p5 = por %p464_p4, %p463_p3 }
  0x31   :  { %405 = vset.pattern.permute.xlu1 %v496_v22 }
  0x32   :  { %367 = vmatpush3.bf16.msra.mxu0 %v366_v18  ;;  %81 = vperm.xlu1 %405, %v45_v3   ;;  %p466_p6 = pnand %p465_p5, %p459_p2 }
  0x33   :  { %368 = vmatprep.subr.bf16.mxu0 %v492_v2 }
  0x34   :  { %406 = vset.pattern.permute.xlu0 %v497_v26 }
  0x35   :  { %88 = vperm.xlu0 %406, %v45_v3  }
  0x36   :  { %370 = vmatpush3.bf16.msra.mxu0 %v369_v23  ;;  %407 = vset.pattern.permute.xlu1 %v498_v28 }
  0x37   :  { %371 = vmatprep.subr.bf16.mxu0 %v492_v2  ;;  %95 = vperm.xlu1 %407, %v45_v3  }
  0x39   :  { %409 = vset.pattern.permute.xlu0 %v499_v32 }
  0x3a   :  { %373 = vmatpush3.bf16.msra.mxu0 %v372_v27 }
  0x3b   :  { %374 = vmatprep.subr.bf16.mxu0 %v492_v2  ;;  %408 = vset.pattern.permute.xlu1 %v499_v32 }
  0x3c   :  { %102 = vperm.xlu1 %408, %v45_v3  }
  0x3e   :  { %376 = vmatpush3.bf16.msra.mxu0 %v375_v31 }
  0x3f   :  { %377 = vmatprep.subr.bf16.mxu0 %v492_v2 }
  0x42   :  { %379 = vmatpush3.bf16.msra.mxu0 %v378_v35 }
  0x43   :  { %380 = vmatprep.subr.bf16.mxu0 %v492_v2 }
  0x46   :  { %382 = vmatpush3.bf16.msra.mxu0 %v381_v38 }
  0xa7   :  { %v75_v39 = vpop.permute.xlu1 %74 }
  0xa8   :  { %v77_v52 = vsel %vm71_vm4, %v75_v39, 0.0 }
  0xaa   :  { %v51_v41 = vpop.permute.xlu0 %50 }
  0xab   :  { %vm52_vm1 = vcmp.eq.s32.totalorder %v51_v41, %v47_v42 }
  0xac   :  { %v66_v43 = vpop.permute.xlu1 %65  ;;  %v295_v45 = vsel %vm52_vm1, 1.0, %v493_v10 }
  0xad   :  { %vm67_vm2 = vcmp.eq.s32.totalorder %v66_v43, %v47_v42 }
  0xae   :  { %v297_v49 = vsel %vm67_vm2, 1.0, %v493_v10 }
  0xaf   :  { %v58_v44 = vpop.permute.xlu0 %57 }
  0xb0   :  { %vm59_vm3 = vcmp.eq.s32.totalorder %v58_v44, %v47_v42 }
  0xb1   :  { %v296_v46 = vsel %vm59_vm3, 1.0, %v493_v10  ;;  %v82_v47 = vpop.permute.xlu1 %81 }
  0xb2   :  { %v62_v48 = vadd.f32 %v296_v46, %v295_v45  ;;  %v84_v55 = vsel %vm79_vm5, %v82_v47, 0.0 }
  0xb4   :  { %v70_v50 = vadd.f32 %v297_v49, %v62_v48  ;;  %v89_v51 = vpop.permute.xlu0 %88 }
  0xb5   :  { %v91_v56 = vsel %vm86_vm6, %v89_v51, 0.0 }
  0xb6   :  { %v78_v53 = vadd.f32 %v77_v52, %v70_v50  ;;  %v96_v54 = vpop.permute.xlu1 %95 }
  0xb7   :  { %v98_v59 = vsel %vm93_vm7, %v96_v54, 0.0 }
  0xb8   :  { %v85_v57 = vadd.f32 %v84_v55, %v78_v53 }
  0xba   :  { %v92_v58 = vadd.f32 %v91_v56, %v85_v57 }
  0xbb   :  { %v103_v60 = vpop.permute.xlu1 %102 }
  0xbc   :  { %v99_v61 = vadd.f32 %v98_v59, %v92_v58  ;;  %v105_v62 = vsel %vm100_vm8, %v103_v60, 0.0 }
  0xbe   :  { %v106_v0 = vadd.f32 %v105_v62, %v99_v61 }
  0xc0   :  { %v110_v1 = vadd.f32 %v298_v63, %v106_v0 }
  0xc2   :  { %352 = vmatmul.mubr.f32.vlgmr.msra.gmra.mrb[0].mxu0 %v110_v1 }
 0x195   :  { %v193_v2 = vpop.f32.mrb[0].mxu0 }
 0x196   :  { %v197_v3 = vmax.f32 %v193_v2, 0.0  ;;  %v353_v4 = vpop.f32.mrb[1].mxu0 }
 0x198   :  { %355 = vmatpush3.xpose.msra.mxu1 %v197_v3 }
 0x19b   :  { %357 = vmatmul.mubr.f32.vlgmr.msra.gmra.mrb[0].mxu1 %v198_v5 }
 0x26e   :  { %v267_v7 = vpop.f32.mrb[0].mxu1 }
 0x26f   :  { %v268_v8 = vadd.f32 %v267_v7, %v200_v6  ;;  %v358_v9 = vpop.f32.mrb[1].mxu1 }
 0x271   :  { %v299_v10 = vmul.f32 -1.442695, %v268_v8 }
 0x273   :  { %410 = vpow2.f32 %v299_v10 }
 0x27d   :  { %v411_v11 = vpop.eup %410 }
 0x27e   :  { %v274_v12 = vadd.f32 1.0, %v411_v11 }
 0x280   :  { %412 = vrcp.f32 %v274_v12 }
 0x28a   :  { %v413_v13 = vpop.eup %412 }
 0x28b   :  { %278 = vst.msk [vmem:[#allocation8] sm:$0x1] %vm277_vm10, %v413_v13 }
 0x28c   :  { %469 = shalt.err (!%p466_p6)
}
 0x28d   :  { %s470_s21 = scalar_lea.hbm %s595_s4, 16 }
 0x28e   :  { %p471_p7 = scmp.ne.s32.totalorder %s595_s4, %s470_s21  ;;  %p474_p8 = scmp.lt.u32.totalorder %s470_s21, %s595_s4 }
 0x290   :  { %p476_p9 = pnand %p474_p8, %p471_p7 }
 0x292   :  { %479 = shalt.err (!%p476_p9)
}
 0x293   :  { %288 = dma.vmem_to_hbm [thread:$0]  %s286_s18, 16, %s595_s4, [#allocation5]  }
 0x294   :  { %484 = dma.done.wait [#allocation5], 16  }
 0x295   :  { %485 = vsyncadd [#allocation5], 4294967280 }
 0x296   :  { %292 = vsyncpa [#allocation4], 1 }
 0x297   :  { %293 = vsyncpa [#allocation7], 1 }
 0x298   :  { %294 = vsyncpa [#allocation5], 1 }

</bundles_post_ra>
